<compile_context>
chip_gen: v7x
topology: tpu7x:2x2x1
jax: 0.10.0
libtpu: 0.0.40
codegen_flags: <defaults>
</compile_context>

<pallas_src>
import functools

import jax
import jax.numpy as jnp
from jax.experimental import pallas as pl
from jax.experimental.pallas import tpu as pltpu


# ----------------------------- fused kernel --------------------------------

def _block2_fused_kernel(x_ref, a1_ref, a2_ref, s1_ref, s2_ref, out_ref,
                         xp_ref, mp_ref, *, H, WC_in, WC_mid, WC_out):
    """One batch element: conv3x3+BN+ReLU -> conv3x3+BN -> + residual."""
    zx = jnp.zeros((1, WC_in), jnp.float32)
    zm = jnp.zeros((1, WC_mid), jnp.float32)

    # Stage 0: input into H-padded VMEM scratch (W padding is encoded in A1/A2).
    xp_ref[pl.ds(0, 1), :] = zx
    xp_ref[pl.ds(H + 1, 1), :] = zx
    xp_ref[pl.ds(1, H), :] = x_ref[0].astype(jnp.float32)

    # Stage 1: conv3x3 + folded BN + ReLU  (3 row-shifted banded matmuls).
    acc1 = jnp.zeros((H, WC_mid), jnp.float32)
    for dy in range(3):
        acc1 = acc1 + jnp.dot(xp_ref[pl.ds(dy, H), :], a1_ref[dy],
                              preferred_element_type=jnp.float32)
    mid = jnp.maximum(acc1 + s1_ref[0, :], 0.0)

    # Intermediate stays in VMEM (never written to HBM).
    mp_ref[pl.ds(0, 1), :] = zm
    mp_ref[pl.ds(H + 1, 1), :] = zm
    mp_ref[pl.ds(1, H), :] = mid

    # Stage 2: conv3x3 + folded BN + residual add.
    acc2 = jnp.zeros((H, WC_out), jnp.float32)
    for dy in range(3):
        acc2 = acc2 + jnp.dot(mp_ref[pl.ds(dy, H), :], a2_ref[dy],
                              preferred_element_type=jnp.float32)
    y = acc2 + s2_ref[0, :] + x_ref[0].astype(jnp.float32)

    out_ref[0] = y.astype(out_ref.dtype)


# ------------------------------ wrapper -------------------------------------

def _fold_bn(conv_bias, gamma, beta, mean, var, eps=1e-5):
    """Fold conv bias + eval-mode BN into per-channel (scale, shift)."""
    scale = gamma / jnp.sqrt(var + eps)
    shift = (conv_bias - mean) * scale + beta
    return scale, shift


def _banded_weights(w_hwio, W):
    """(3,3,Cin,Cout) conv weights -> (3, W*Cin, W*Cout) banded row matrices.

    A[dy][wi*Cin+ci, wo*Cout+co] = w[dy, wi-wo+1, ci, co] when the dx tap is in
    range, else 0.  Encodes the 3 dx taps and the W-direction zero padding, so
    one matmul per dy produces a full conv output row block.
    """
    wi = jnp.arange(W)[:, None]
    wo = jnp.arange(W)[None, :]
    dx = wi - wo + 1
    valid = (dx >= 0) & (dx <= 2)
    wg = w_hwio[:, jnp.clip(dx, 0, 2), :, :]                # (3, W, W, Cin, Cout)
    wg = jnp.where(valid[None, :, :, None, None], wg, 0.0)
    Cin, Cout = w_hwio.shape[2], w_hwio.shape[3]
    return jnp.transpose(wg, (0, 1, 3, 2, 4)).reshape(3, W * Cin, W * Cout)


def block_type2_forward(x_nchw, params):
    """JAX/Pallas equivalent of BlockType2.forward (NCHW in, NCHW out)."""
    N, Cin, H, W = x_nchw.shape

    # Fold BN into per-channel scale/shift; fold scale into the conv weights.
    s1, b1 = _fold_bn(params["conv_t1_b"], params["bn_t1_gamma"],
                      params["bn_t1_beta"], params["bn_t1_mean"],
                      params["bn_t1_var"])
    s2, b2 = _fold_bn(params["conv1_b"], params["bn1_gamma"],
                      params["bn1_beta"], params["bn1_mean"],
                      params["bn1_var"])
    w1 = params["conv_t1_w_hwio"] * s1[None, None, None, :]
    w2 = params["conv1_w_hwio"] * s2[None, None, None, :]
    Cm = w1.shape[-1]
    Cout = w2.shape[-1]
    assert Cin == Cout, "residual add requires inplanes == planes"

    a1 = _banded_weights(w1, W).astype(jnp.float32)          # (3, W*Cin, W*Cm)
    a2 = _banded_weights(w2, W).astype(jnp.float32)          # (3, W*Cm, W*Cout)
    s1w = jnp.tile(b1, W).reshape(1, W * Cm).astype(jnp.float32)
    s2w = jnp.tile(b2, W).reshape(1, W * Cout).astype(jnp.float32)

    # NCHW -> lane-dense (N, H, W*C)  (free reshape after the transpose).
    x = jnp.transpose(x_nchw, (0, 2, 3, 1)).reshape(N, H, W * Cin)

    kernel = functools.partial(_block2_fused_kernel, H=H,
                               WC_in=W * Cin, WC_mid=W * Cm, WC_out=W * Cout)

    out = pl.pallas_call(
        kernel,
        out_shape=jax.ShapeDtypeStruct((N, H, W * Cout), jnp.float32),
        grid=(N,),
        in_specs=[
            pl.BlockSpec((1, H, W * Cin), lambda n: (n, 0, 0)),
            pl.BlockSpec((3, W * Cin, W * Cm), lambda n: (0, 0, 0)),
            pl.BlockSpec((3, W * Cm, W * Cout), lambda n: (0, 0, 0)),
            pl.BlockSpec((1, W * Cm), lambda n: (0, 0)),
            pl.BlockSpec((1, W * Cout), lambda n: (0, 0)),
        ],
        out_specs=pl.BlockSpec((1, H, W * Cout), lambda n: (n, 0, 0)),
        scratch_shapes=[
            pltpu.VMEM((H + 2, W * Cin), jnp.float32),   # H-padded input
            pltpu.VMEM((H + 2, W * Cm), jnp.float32),    # H-padded intermediate
        ],
        compiler_params=pltpu.CompilerParams(
            dimension_semantics=("parallel",)),
    )(x, a1, a2, s1w, s2w)

    return jnp.transpose(out.reshape(N, H, W, Cout), (0, 3, 1, 2))


# ---------------- pure-JAX reference (for correctness check) ----------------

def _ref_conv3x3(x_nchw, w_oihw, b):
    out = jax.lax.conv_general_dilated(
        x_nchw, w_oihw, window_strides=(1, 1), padding=((1, 1), (1, 1)),
        dimension_numbers=("NCHW", "OIHW", "NCHW"))
    return out + b[None, :, None, None]


def _ref_bn(x, gamma, beta, mean, var, eps=1e-5):
    return ((x - mean[None, :, None, None])
            / jnp.sqrt(var[None, :, None, None] + eps)
            * gamma[None, :, None, None] + beta[None, :, None, None])


def _ref_forward(x, p):
    out = _ref_conv3x3(x, p["conv_t1_w_oihw"], p["conv_t1_b"])
    out = _ref_bn(out, p["bn_t1_gamma"], p["bn_t1_beta"],
                  p["bn_t1_mean"], p["bn_t1_var"])
    out = jnp.maximum(out, 0.0)
    out = _ref_conv3x3(out, p["conv1_w_oihw"], p["conv1_b"])
    out = _ref_bn(out, p["bn1_gamma"], p["bn1_beta"],
                  p["bn1_mean"], p["bn1_var"])
    return out + x


# ---------------------------------------------------------------------------

def make_params(key, inplanes, planes):
    ks = jax.random.split(key, 10)
    p = {}
    # BlockType1.conv1 : Conv2d(inplanes, planes, 3, pad=1, bias=True)
    p["conv_t1_w_oihw"] = 0.1 * jax.random.normal(ks[0], (planes, inplanes, 3, 3), jnp.float32)
    p["conv_t1_b"] = 0.1 * jax.random.normal(ks[1], (planes,), jnp.float32)
    # BlockType1.bn1
    p["bn_t1_gamma"] = 1.0 + 0.1 * jax.random.normal(ks[2], (planes,), jnp.float32)
    p["bn_t1_beta"] = 0.1 * jax.random.normal(ks[3], (planes,), jnp.float32)
    p["bn_t1_mean"] = 0.1 * jax.random.normal(ks[4], (planes,), jnp.float32)
    p["bn_t1_var"] = jnp.abs(jax.random.normal(ks[5], (planes,), jnp.float32)) + 0.5
    # BlockType2.conv1 : Conv2d(planes, planes, 3, pad=1, bias=True)
    p["conv1_w_oihw"] = 0.1 * jax.random.normal(ks[6], (planes, planes, 3, 3), jnp.float32)
    p["conv1_b"] = 0.1 * jax.random.normal(ks[7], (planes,), jnp.float32)
    # BlockType2.bn1
    p["bn1_gamma"] = 1.0 + 0.1 * jax.random.normal(ks[8], (planes,), jnp.float32)
    p["bn1_beta"] = 0.1 * jax.random.normal(ks[9], (planes,), jnp.float32)
    p["bn1_mean"] = jnp.zeros((planes,), jnp.float32)
    p["bn1_var"] = jnp.ones((planes,), jnp.float32)
    # HWIO weights for the NHWC/lane-dense kernel
    p["conv_t1_w_hwio"] = jnp.transpose(p["conv_t1_w_oihw"], (2, 3, 1, 0))
    p["conv1_w_hwio"] = jnp.transpose(p["conv1_w_oihw"], (2, 3, 1, 0))
    return p


if __name__ == "__main__":
    N, C, H, W = 2, 4, 16, 16  # residual requires inplanes == planes
    key = jax.random.PRNGKey(0)
    kx, kp = jax.random.split(key)
    x = jax.random.normal(kx, (N, C, H, W), jnp.float32)
    params = make_params(kp, C, C)

    out = block_type2_forward(x, params)
    out = jax.block_until_ready(out)

    ref = _ref_forward(x, params)
    assert out.shape == (N, C, H, W)
    assert jnp.allclose(out, ref, rtol=1e-4, atol=1e-4), \
        f"max err {jnp.max(jnp.abs(out - ref))}"

    print("KERNEL_OK")
</pallas_src>

<mosaic_0001>
module attributes {stable_mosaic.version = 11 : i64} {
  func.func @_block2_fused_kernel(%arg0: i32, %arg1: memref<1x16x64xf32, #tpu.memory_space<vmem>>, %arg2: memref<3x64x64xf32, #tpu.memory_space<vmem>>, %arg3: memref<3x64x64xf32, #tpu.memory_space<vmem>>, %arg4: memref<1x64xf32, #tpu.memory_space<vmem>>, %arg5: memref<1x64xf32, #tpu.memory_space<vmem>>, %arg6: memref<1x16x64xf32, #tpu.memory_space<vmem>>, %arg7: memref<18x64xf32, #tpu.memory_space<vmem>>, %arg8: memref<18x64xf32, #tpu.memory_space<vmem>>) attributes {dimension_semantics = [#tpu.dimension_semantics<parallel>], iteration_bounds = array<i64: 2>, scalar_prefetch = 0 : i64, scratch_operands = 2 : i64, tpu.core_type = #tpu.core_type<tc>, window_params = [{transform_indices = @transform_0, window_bounds = array<i64: 1, 16, 64>}, {pipeline_mode = #tpu.pipeline_mode<synchronous>, transform_indices = @transform_1, window_bounds = array<i64: 3, 64, 64>}, {pipeline_mode = #tpu.pipeline_mode<synchronous>, transform_indices = @transform_2, window_bounds = array<i64: 3, 64, 64>}, {pipeline_mode = #tpu.pipeline_mode<synchronous>, transform_indices = @transform_3, window_bounds = array<i64: 1, 64>}, {pipeline_mode = #tpu.pipeline_mode<synchronous>, transform_indices = @transform_4, window_bounds = array<i64: 1, 64>}, {transform_indices = @transform_5, window_bounds = array<i64: 1, 16, 64>}]} {
    %cst = arith.constant 0.000000e+00 : f32
    %0 = vector.broadcast %cst : f32 to vector<1x64xf32>
    %cst_0 = arith.constant 0.000000e+00 : f32
    %1 = vector.broadcast %cst_0 : f32 to vector<1x64xf32>
    %c0 = arith.constant 0 : index
    %c0_1 = arith.constant 0 : index
    %2 = vector.load %arg7[%c0, %c0_1] : memref<18x64xf32, #tpu.memory_space<vmem>>, vector<1x64xf32>
    tpu.vector_store %arg7[%c0, %c0_1], %0 {strides = array<i32>} : memref<18x64xf32, #tpu.memory_space<vmem>>, vector<1x64xf32>,
    %c17 = arith.constant 17 : index
    %c0_2 = arith.constant 0 : index
    %3 = vector.load %arg7[%c17, %c0_2] : memref<18x64xf32, #tpu.memory_space<vmem>>, vector<1x64xf32>
    tpu.vector_store %arg7[%c17, %c0_2], %0 {strides = array<i32>} : memref<18x64xf32, #tpu.memory_space<vmem>>, vector<1x64xf32>,
    %c0_3 = arith.constant 0 : index
    %c0_4 = arith.constant 0 : index
    %c0_5 = arith.constant 0 : index
    %4 = vector.load %arg1[%c0_3, %c0_4, %c0_5] : memref<1x16x64xf32, #tpu.memory_space<vmem>>, vector<1x16x64xf32>
    %5 = vector.shape_cast %4 : vector<1x16x64xf32> to vector<16x64xf32>
    %c1 = arith.constant 1 : index
    %c0_6 = arith.constant 0 : index
    %6 = vector.load %arg7[%c1, %c0_6] : memref<18x64xf32, #tpu.memory_space<vmem>>, vector<16x64xf32>
    tpu.vector_store %arg7[%c1, %c0_6], %5 {strides = array<i32>} : memref<18x64xf32, #tpu.memory_space<vmem>>, vector<16x64xf32>,
    %cst_7 = arith.constant 0.000000e+00 : f32
    %7 = vector.broadcast %cst_7 : f32 to vector<16x64xf32>
    %c0_8 = arith.constant 0 : index
    %c0_9 = arith.constant 0 : index
    %8 = vector.load %arg7[%c0_8, %c0_9] : memref<18x64xf32, #tpu.memory_space<vmem>>, vector<16x64xf32>
    %c0_10 = arith.constant 0 : index
    %c0_11 = arith.constant 0 : index
    %c0_12 = arith.constant 0 : index
    %9 = vector.load %arg2[%c0_10, %c0_11, %c0_12] : memref<3x64x64xf32, #tpu.memory_space<vmem>>, vector<1x64x64xf32>
    %10 = vector.shape_cast %9 : vector<1x64x64xf32> to vector<64x64xf32>
    %cst_13 = arith.constant dense<0.000000e+00> : vector<16x64xf32>
    %11 = tpu.matmul %8, %10, %cst_13 {dimension_numbers = #tpu.dot_dimension_numbers<[1], [0], [0], [1], [0, 0, 1, 1], [], []>} : vector<16x64xf32>, vector<64x64xf32>, vector<16x64xf32> -> vector<16x64xf32>
    %12 = arith.addf %7, %11 : vector<16x64xf32>
    %c1_14 = arith.constant 1 : index
    %c0_15 = arith.constant 0 : index
    %13 = vector.load %arg7[%c1_14, %c0_15] : memref<18x64xf32, #tpu.memory_space<vmem>>, vector<16x64xf32>
    %c1_16 = arith.constant 1 : index
    %c0_17 = arith.constant 0 : index
    %c0_18 = arith.constant 0 : index
    %14 = vector.load %arg2[%c1_16, %c0_17, %c0_18] : memref<3x64x64xf32, #tpu.memory_space<vmem>>, vector<1x64x64xf32>
    %15 = vector.shape_cast %14 : vector<1x64x64xf32> to vector<64x64xf32>
    %cst_19 = arith.constant dense<0.000000e+00> : vector<16x64xf32>
    %16 = tpu.matmul %13, %15, %cst_19 {dimension_numbers = #tpu.dot_dimension_numbers<[1], [0], [0], [1], [0, 0, 1, 1], [], []>} : vector<16x64xf32>, vector<64x64xf32>, vector<16x64xf32> -> vector<16x64xf32>
    %17 = arith.addf %12, %16 : vector<16x64xf32>
    %c2 = arith.constant 2 : index
    %c0_20 = arith.constant 0 : index
    %18 = vector.load %arg7[%c2, %c0_20] : memref<18x64xf32, #tpu.memory_space<vmem>>, vector<16x64xf32>
    %c2_21 = arith.constant 2 : index
    %c0_22 = arith.constant 0 : index
    %c0_23 = arith.constant 0 : index
    %19 = vector.load %arg2[%c2_21, %c0_22, %c0_23] : memref<3x64x64xf32, #tpu.memory_space<vmem>>, vector<1x64x64xf32>
    %20 = vector.shape_cast %19 : vector<1x64x64xf32> to vector<64x64xf32>
    %cst_24 = arith.constant dense<0.000000e+00> : vector<16x64xf32>
    %21 = tpu.matmul %18, %20, %cst_24 {dimension_numbers = #tpu.dot_dimension_numbers<[1], [0], [0], [1], [0, 0, 1, 1], [], []>} : vector<16x64xf32>, vector<64x64xf32>, vector<16x64xf32> -> vector<16x64xf32>
    %22 = arith.addf %17, %21 : vector<16x64xf32>
    %c0_25 = arith.constant 0 : index
    %c0_26 = arith.constant 0 : index
    %23 = vector.load %arg4[%c0_25, %c0_26] : memref<1x64xf32, #tpu.memory_space<vmem>>, vector<1x64xf32>
    %24 = vector.shape_cast %23 : vector<1x64xf32> to vector<64xf32>
    %25 = vector.shape_cast %24 : vector<64xf32> to vector<1x64xf32>
    %26 = vector.broadcast %25 : vector<1x64xf32> to vector<16x64xf32>
    %27 = arith.addf %22, %26 : vector<16x64xf32>
    %cst_27 = arith.constant 0.000000e+00 : f32
    %28 = vector.broadcast %cst_27 : f32 to vector<16x64xf32>
    %29 = arith.maximumf %27, %28 : vector<16x64xf32>
    %c0_28 = arith.constant 0 : index
    %c0_29 = arith.constant 0 : index
    %30 = vector.load %arg8[%c0_28, %c0_29] : memref<18x64xf32, #tpu.memory_space<vmem>>, vector<1x64xf32>
    tpu.vector_store %arg8[%c0_28, %c0_29], %1 {strides = array<i32>} : memref<18x64xf32, #tpu.memory_space<vmem>>, vector<1x64xf32>,
    %c17_30 = arith.constant 17 : index
    %c0_31 = arith.constant 0 : index
    %31 = vector.load %arg8[%c17_30, %c0_31] : memref<18x64xf32, #tpu.memory_space<vmem>>, vector<1x64xf32>
    tpu.vector_store %arg8[%c17_30, %c0_31], %1 {strides = array<i32>} : memref<18x64xf32, #tpu.memory_space<vmem>>, vector<1x64xf32>,
    %c1_32 = arith.constant 1 : index
    %c0_33 = arith.constant 0 : index
    %32 = vector.load %arg8[%c1_32, %c0_33] : memref<18x64xf32, #tpu.memory_space<vmem>>, vector<16x64xf32>
    tpu.vector_store %arg8[%c1_32, %c0_33], %29 {strides = array<i32>} : memref<18x64xf32, #tpu.memory_space<vmem>>, vector<16x64xf32>,
    %cst_34 = arith.constant 0.000000e+00 : f32
    %33 = vector.broadcast %cst_34 : f32 to vector<16x64xf32>
    %c0_35 = arith.constant 0 : index
    %c0_36 = arith.constant 0 : index
    %34 = vector.load %arg8[%c0_35, %c0_36] : memref<18x64xf32, #tpu.memory_space<vmem>>, vector<16x64xf32>
    %c0_37 = arith.constant 0 : index
    %c0_38 = arith.constant 0 : index
    %c0_39 = arith.constant 0 : index
    %35 = vector.load %arg3[%c0_37, %c0_38, %c0_39] : memref<3x64x64xf32, #tpu.memory_space<vmem>>, vector<1x64x64xf32>
    %36 = vector.shape_cast %35 : vector<1x64x64xf32> to vector<64x64xf32>
    %cst_40 = arith.constant dense<0.000000e+00> : vector<16x64xf32>
    %37 = tpu.matmul %34, %36, %cst_40 {dimension_numbers = #tpu.dot_dimension_numbers<[1], [0], [0], [1], [0, 0, 1, 1], [], []>} : vector<16x64xf32>, vector<64x64xf32>, vector<16x64xf32> -> vector<16x64xf32>
    %38 = arith.addf %33, %37 : vector<16x64xf32>
    %c1_41 = arith.constant 1 : index
    %c0_42 = arith.constant 0 : index
    %39 = vector.load %arg8[%c1_41, %c0_42] : memref<18x64xf32, #tpu.memory_space<vmem>>, vector<16x64xf32>
    %c1_43 = arith.constant 1 : index
    %c0_44 = arith.constant 0 : index
    %c0_45 = arith.constant 0 : index
    %40 = vector.load %arg3[%c1_43, %c0_44, %c0_45] : memref<3x64x64xf32, #tpu.memory_space<vmem>>, vector<1x64x64xf32>
    %41 = vector.shape_cast %40 : vector<1x64x64xf32> to vector<64x64xf32>
    %cst_46 = arith.constant dense<0.000000e+00> : vector<16x64xf32>
    %42 = tpu.matmul %39, %41, %cst_46 {dimension_numbers = #tpu.dot_dimension_numbers<[1], [0], [0], [1], [0, 0, 1, 1], [], []>} : vector<16x64xf32>, vector<64x64xf32>, vector<16x64xf32> -> vector<16x64xf32>
    %43 = arith.addf %38, %42 : vector<16x64xf32>
    %c2_47 = arith.constant 2 : index
    %c0_48 = arith.constant 0 : index
    %44 = vector.load %arg8[%c2_47, %c0_48] : memref<18x64xf32, #tpu.memory_space<vmem>>, vector<16x64xf32>
    %c2_49 = arith.constant 2 : index
    %c0_50 = arith.constant 0 : index
    %c0_51 = arith.constant 0 : index
    %45 = vector.load %arg3[%c2_49, %c0_50, %c0_51] : memref<3x64x64xf32, #tpu.memory_space<vmem>>, vector<1x64x64xf32>
    %46 = vector.shape_cast %45 : vector<1x64x64xf32> to vector<64x64xf32>
    %cst_52 = arith.constant dense<0.000000e+00> : vector<16x64xf32>
    %47 = tpu.matmul %44, %46, %cst_52 {dimension_numbers = #tpu.dot_dimension_numbers<[1], [0], [0], [1], [0, 0, 1, 1], [], []>} : vector<16x64xf32>, vector<64x64xf32>, vector<16x64xf32> -> vector<16x64xf32>
    %48 = arith.addf %43, %47 : vector<16x64xf32>
    %c0_53 = arith.constant 0 : index
    %c0_54 = arith.constant 0 : index
    %49 = vector.load %arg5[%c0_53, %c0_54] : memref<1x64xf32, #tpu.memory_space<vmem>>, vector<1x64xf32>
    %50 = vector.shape_cast %49 : vector<1x64xf32> to vector<64xf32>
    %51 = vector.shape_cast %50 : vector<64xf32> to vector<1x64xf32>
    %52 = vector.broadcast %51 : vector<1x64xf32> to vector<16x64xf32>
    %53 = arith.addf %48, %52 : vector<16x64xf32>
    %c0_55 = arith.constant 0 : index
    %c0_56 = arith.constant 0 : index
    %c0_57 = arith.constant 0 : index
    %54 = vector.load %arg1[%c0_55, %c0_56, %c0_57] : memref<1x16x64xf32, #tpu.memory_space<vmem>>, vector<1x16x64xf32>
    %55 = vector.shape_cast %54 : vector<1x16x64xf32> to vector<16x64xf32>
    %56 = arith.addf %53, %55 : vector<16x64xf32>
    %c0_58 = arith.constant 0 : index
    %c0_59 = arith.constant 0 : index
    %c0_60 = arith.constant 0 : index
    %57 = vector.load %arg6[%c0_58, %c0_59, %c0_60] : memref<1x16x64xf32, #tpu.memory_space<vmem>>, vector<1x16x64xf32>
    %58 = vector.shape_cast %57 : vector<1x16x64xf32> to vector<16x64xf32>
    %59 = vector.shape_cast %56 : vector<16x64xf32> to vector<1x16x64xf32>
    tpu.vector_store %arg6[%c0_58, %c0_59, %c0_60], %59 {strides = array<i32>} : memref<1x16x64xf32, #tpu.memory_space<vmem>>, vector<1x16x64xf32>,
    return
  }
  func.func @transform_0(%arg0: i32) -> (i32, i32, i32) {
    %c0_i32 = arith.constant 0 : i32
    %c0_i32_0 = arith.constant 0 : i32
    %c0_i32_1 = arith.constant 0 : i32
    return %arg0, %c0_i32, %c0_i32_0 : i32, i32, i32
  }
  func.func @transform_1(%arg0: i32) -> (i32, i32, i32) {
    %c0_i32 = arith.constant 0 : i32
    %c0_i32_0 = arith.constant 0 : i32
    %c0_i32_1 = arith.constant 0 : i32
    %c0_i32_2 = arith.constant 0 : i32
    return %c0_i32, %c0_i32_0, %c0_i32_1 : i32, i32, i32
  }
  func.func @transform_2(%arg0: i32) -> (i32, i32, i32) {
    %c0_i32 = arith.constant 0 : i32
    %c0_i32_0 = arith.constant 0 : i32
    %c0_i32_1 = arith.constant 0 : i32
    %c0_i32_2 = arith.constant 0 : i32
    return %c0_i32, %c0_i32_0, %c0_i32_1 : i32, i32, i32
  }
  func.func @transform_3(%arg0: i32) -> (i32, i32) {
    %c0_i32 = arith.constant 0 : i32
    %c0_i32_0 = arith.constant 0 : i32
    %c0_i32_1 = arith.constant 0 : i32
    return %c0_i32, %c0_i32_0 : i32, i32
  }
  func.func @transform_4(%arg0: i32) -> (i32, i32) {
    %c0_i32 = arith.constant 0 : i32
    %c0_i32_0 = arith.constant 0 : i32
    %c0_i32_1 = arith.constant 0 : i32
    return %c0_i32, %c0_i32_0 : i32, i32
  }
  func.func @transform_5(%arg0: i32) -> (i32, i32, i32) {
    %c0_i32 = arith.constant 0 : i32
    %c0_i32_0 = arith.constant 0 : i32
    %c0_i32_1 = arith.constant 0 : i32
    return %arg0, %c0_i32, %c0_i32_0 : i32, i32, i32
  }
}

</mosaic_0001>

<bundles_post_ra>
// kernel: tpu_custom_call.1
= control target key start
LH: loop header
LB: loop body
LE: loop exit
PB: predicated region body
PF: predicated region fallthrough
CT: control target
= control target key end

     0   :  { %10 = vsyncpa [#allocation5], 0  ;;  %s1830_s0 = inlined_call_operand.hbm [shape: f32[2,16,64], index: 0, kind: input, shape index: {}]   ;;  %s1831_s1 = inlined_call_operand.hbm [shape: f32[3,64,64], index: 1, kind: input, shape index: {}]   ;;  %s1832_s2 = inlined_call_operand.hbm [shape: f32[3,64,64], index: 2, kind: input, shape index: {}]   ;;  %s1833_s3 = inlined_call_operand.vmem [shape: f32[1,64], index: 3, kind: input, shape index: {}]   ;;  %s1834_s4 = inlined_call_operand.vmem [shape: f32[1,64], index: 4, kind: input, shape index: {}]   ;;  %s1835_s5 = inlined_call_operand.hbm [shape: f32[2,16,64], index: 5, kind: output, shape index: {}]  }
   0x1   :  { %12 = vsyncpa [#allocation5 + $0x1], 0 }
   0x2   :  { %13 = vsyncpa [#allocation8], 0 }
   0x3   :  { %14 = vsyncpa [#allocation6], 0 }
   0x4   :  { %16 = vsyncpa [#allocation6 + $0x1], 0  ;;  %s1551_s18 = smov 0   ;;  %s1553_s19 = smov 0  }
   0x5   :  { %s1555_s20 = smov 0   ;;  %s1557_s21 = smov 0  }
   0x6 LB: > { %s1572_s22 = sadd.s32 4294967295, %s1510_s21   ;;  %s970_s23 = sadd.s32 4294967294, %s1510_s21   ;;  %s1510_s21 = sphi %s1557_s21, %s1855_s21   ;;  %s1506_s20 = sphi %s1555_s20, %s1854_s20   ;;  %s1502_s19 = sphi %s1553_s19, %s1853_s19   ;;  %s1498_s18 = sphi %s1551_s18, %s1852_s18  }
   0x7   : > { %p42_p0 = scmp.ne.s32.totalorder %s1502_s19, %s1498_s18  ;;  %p1836_p1 = scmp.eq.s32.totalorder %s1572_s22, 0 }
   0x8   : > { %p156_p3 = scmp.eq.s32.totalorder %s970_s23, 1  ;;  %p971_p5 = scmp.ge.s32.totalorder %s1510_s21, 1 }
   0x9   : > { %p1581_p4 = por %p1836_p1, %p42_p0  ;;  %p163_p7 = scmp.lt.s32.totalorder %s1510_s21, 3 }
   0xa   : > { %p1586_p6 = por %p156_p3, %p42_p0  ;;  %s1512_s27 = smov [#allocation7]  }
   0xb   : > { %s1839_s24 = scalar_select %p1581_p4, 1, 0 }
   0xc   : > { %s1840_s25 = scalar_select %p1586_p6, 1, 0 }
   0xd   : > { %p1591_p8 = pnand %p971_p5, %p163_p7  ;;  %s175_s28 = sshll.u32 %s1512_s27, 4  ;;  %s1595_s28 = int_to_ptr.vmem [resolvable:$true] %s175_s28 }
   0xe   : > { %s1513_s30 = smov [#allocation9]   ;;  %s1354_s9 = scalar_lea.hbm %s1831_s1, 3072 }
   0xf   : > { %p1294_p9 = pneg %p1591_p8  ;;  %s188_s6 = sshll.u32 %s1513_s30, 4  ;;  %s1606_s6 = int_to_ptr.vmem [resolvable:$true] %s188_s6 }
  0x10   : > { %p1355_p12 = scmp.ne.s32.totalorder %s1831_s1, %s1354_s9  ;;  %p1361_p5 = scmp.lt.u32.totalorder %s1354_s9, %s1831_s1 }
  0x11   : > { %p1602_p11 = pnand %p1294_p9, %p1836_p1 }
  0x13   : > { %p1356_p13 = pneg %p1602_p11 }
  0x15   : > { %p1357_p0 = pnand %p1356_p13, %p1355_p12 }
  0x17   : > { %p1358_p3 = pneg %p1357_p0 }
  0x19   : > { %p1363_p7 = pnand %p1361_p5, %p1358_p3 }
  0x1b   : > { %1366 = shalt.err (!%p1363_p7)
}
  0x1c   : > { %s1367_s14 = scalar_lea.vmem %s1595_s28, 3072  ;;  %p1375_p2 = scmp.lt.s32.totalorder %s1595_s28, %s1595_s28 }
  0x1d   : > { %p1368_p9 = scmp.ne.s32.totalorder %s1595_s28, %s1367_s14  ;;  %p1376_p12 = scmp.lt.s32.totalorder %s1367_s14, %s1367_s14 }
  0x1f   : > { %p1370_p10 = pnand %p1368_p9, %p1356_p13  ;;  %p1377_p0 = por %p1376_p12, %p1375_p2 }
  0x21   : > { %p1371_p1 = pneg %p1370_p10 }
  0x23   : > { %p1378_p6 = pnand %p1377_p0, %p1371_p1 }
  0x25   : > { %1381 = shalt.err (!%p1378_p6)
}
  0x26   : > { %s1514_s15 = smov 128   ;;  %s1515_s16 = smov 8  }
  0x27   : > { %1297 = dma.hbm_to_vmem [thread:$0]  (!%p1602_p11), %s1831_s1, 3072, %s1595_s28, [#allocation8], %s1514_s15, %s1514_s15, %s1515_s16  }
  0x28   : > { %s1382_s7 = scalar_lea.hbm %s1832_s2, 3072 }
  0x29   : > { %p1383_p1 = scmp.ne.s32.totalorder %s1832_s2, %s1382_s7  ;;  %p1389_p10 = scmp.lt.u32.totalorder %s1382_s7, %s1832_s2 }
  0x2b   : > { %p1385_p2 = pnand %p1383_p1, %p1356_p13 }
  0x2d   : > { %p1386_p6 = pneg %p1385_p2 }
  0x2f   : > { %p1391_p3 = pnand %p1389_p10, %p1386_p6 }
  0x31   : > { %1394 = shalt.err (!%p1391_p3)
}
  0x32   : > { %s1395_s28 = scalar_lea.vmem %s1606_s6, 3072  ;;  %p1403_p12 = scmp.lt.s32.totalorder %s1606_s6, %s1606_s6 }
  0x33   : > { %p1396_p5 = scmp.ne.s32.totalorder %s1606_s6, %s1395_s28  ;;  %p1404_p0 = scmp.lt.s32.totalorder %s1395_s28, %s1395_s28 }
  0x35   : > { %p1398_p7 = pnand %p1396_p5, %p1356_p13  ;;  %p1405_p1 = por %p1404_p0, %p1403_p12 }
  0x37   : > { %p1399_p9 = pneg %p1398_p7 }
  0x39   : > { %p1406_p2 = pnand %p1405_p1, %p1399_p9 }
  0x3b   : > { %1409 = shalt.err (!%p1406_p2)
}
  0x3c   : > { %1300 = dma.hbm_to_vmem [thread:$0]  (!%p1602_p11), %s1832_s2, 3072, %s1606_s6, [#allocation8], %s1514_s15, %s1514_s15, %s1515_s16  }
  0x3d   : > { %s1667_s29 = sadd.s32 1, %s1510_s21   ;;  %s29_s14 = sadd.s32 1, %s1506_s20 }
  0x3e   : > { %s26_s17 = ssub.s32 %s1510_s21, %s1667_s29  ;;  %p36_p13 = scmp.ne.s32.totalorder %s1506_s20, %s1502_s19 }
  0x3f   : > { %p27_p6 = scmp.eq.s32.totalorder %s26_s17, 0  ;;  %p37_p10 = scmp.eq.s32.totalorder %s1510_s21, 0 }
  0x40   : > { %p1843_p3 = scmp.eq.s32.totalorder %s1572_s22, 1  ;;  %p1311_p7 = scmp.lt.s32.totalorder %s1510_s21, 2 }
  0x41   : > { %s1683_s27 = scalar_select %p27_p6, %s1506_s20, %s29_s14  }
  0x42   : > { %p1677_p5 = por %p1843_p3, %p36_p13  ;;  %p38_p9 = por %p37_p10, %p36_p13 }
  0x43   : > { %s208_s30 = sand.u32 1, %s1506_s20   ;;  %s1002_s6 = sshll.u32 %s1510_s21, 8 }
  0x44   : > { %s1844_s23 = scalar_select %p1677_p5, 1, 0 }
  0x45   : > { %s975_s7 = sshll.u32 %s208_s30, 4  ;;  %s1690_s10 = scalar_lea.hbm %s1830_s0, %s1002_s6 }
  0x46   : > { %s212_s11 = scalar_lea.vmem [#allocation4], %s975_s7  ;;  %p1694_p11 = pnand %p1311_p7, %p38_p9 }
  0x47   : > { %s219_s28 = sshll.u32 %s212_s11, 4  ;;  %s1698_s13 = scalar_lea.sflag [#allocation5], %s208_s30  ;;  %s1692_s28 = int_to_ptr.vmem [resolvable:$true] %s219_s28 }
  0x48   : > { %s1410_s14 = scalar_lea.hbm %s1690_s10, 256  ;;  %p1412_p0 = pneg %p1694_p11 }
  0x49   : > { %p1411_p12 = scmp.ne.s32.totalorder %s1690_s10, %s1410_s14  ;;  %s1415_s6 = scalar_lea.hbm %s1830_s0, 512 }
  0x4a   : > { %p1416_p13 = scmp.lt.u32.totalorder %s1690_s10, %s1830_s0  ;;  %p1417_p6 = scmp.lt.u32.totalorder %s1415_s6, %s1410_s14 }
  0x4b   : > { %p1413_p1 = pnand %p1412_p0, %p1411_p12  ;;  %p1419_p3 = scmp.lt.u32.totalorder %s1410_s14, %s1690_s10 }
  0x4c   : > { %p1418_p10 = por %p1417_p6, %p1416_p13 }
  0x4d   : > { %p1414_p2 = pneg %p1413_p1 }
  0x4e   : > { %p1420_p7 = por %p1419_p3, %p1418_p10 }
  0x50   : > { %p1421_p9 = pnand %p1420_p7, %p1414_p2 }
  0x52   : > { %1424 = shalt.err (!%p1421_p9)
}
  0x53   : > { %s1425_s30 = scalar_lea.vmem %s1692_s28, 256  ;;  %s1516_s11 = smov [#allocation4]  }
  0x54   : > { %p1426_p12 = scmp.ne.s32.totalorder %s1692_s28, %s1425_s30  ;;  %s1430_s17 = sshll.u32 %s1516_s11, 4  ;;  %s1431_s17 = int_to_ptr.vmem [resolvable:$false] %s1430_s17 }
  0x55   : > { %s1432_s7 = scalar_lea.vmem %s1431_s17, 512  ;;  %p1433_p4 = scmp.lt.s32.totalorder %s1692_s28, %s1431_s17 }
  0x56   : > { %p1428_p1 = pnand %p1426_p12, %p1412_p0  ;;  %p1434_p13 = scmp.lt.s32.totalorder %s1432_s7, %s1425_s30 }
  0x58   : > { %p1429_p5 = pneg %p1428_p1  ;;  %p1435_p6 = por %p1434_p13, %p1433_p4 }
  0x5a   : > { %p1436_p10 = pnand %p1435_p6, %p1429_p5 }
  0x5c   : > { %1439 = shalt.err (!%p1436_p10)
}
  0x5d   : > { %1304 = dma.hbm_to_vmem [thread:$0]  (!%p1694_p11), %s1690_s10, 256, %s1692_s28, %s1698_s13, %s1514_s15, %s1514_s15, %s1515_s16  }
  0x5e   : > { %231 = sbr.rel (%p1591_p8) target bundleno = 646 (0x286), region = 40  ;;  %s1732_s14 = sand.u32 (!%p1591_p8), 1, %s1502_s19  }
  0x5f   : > { %s979_s6 = sshll.u32 (!%p1591_p8), %s1732_s14, 4  ;;  %s234_s8 = scalar_lea.sflag (!%p1591_p8), [#allocation5], %s1732_s14 }
  0x60   : > { %s237_s12 = scalar_lea.vmem (!%p1591_p8), [#allocation4], %s979_s6  ;;  %p1846_p4 = scmp.ne.s32.totalorder (!%p1591_p8), %s1839_s24, 0 }
  0x65   : > { %1485 = dma.done.wait (%p1846_p4), %s234_s8, 256  }
  0x66   : > { %1487 = vsyncadd (%p1846_p4), %s234_s8, 4294967040  ;;  %p1847_p5 = scmp.eq.s32.totalorder %s1572_s22, 0 }
  0x68   : > { %1489 = dma.done.wait (%p1847_p5), [#allocation8], 6144   ;;  %p1848_p8 = pmov %p1847_p5 }
  0x69   : > { %vm272_vm0 = vcmask 516096   ;;  %v1517_v0 = vmov 0.0   ;;  %v293_v1 = vld [vmem:[#allocation7 + $0x40] sm:$0xff]  ;;  %v294_v2 = vld [vmem:[#allocation7 + $0x48] sm:$0xff]  ;;  %v295_v3 = vld [vmem:[#allocation7 + $0x50] sm:$0xff]  ;;  %vm277_vm1 = vcmask 523264  }
  0x6a   : > { %1491 = vsyncadd (%p1848_p8), [#allocation8], 4294961152  ;;  %273 = vst.msk [vmem:[#allocation2] sm:$0x1] %vm272_vm0, %v1517_v0  ;;  %v1178_v4 = vpack.c.bf16 %v294_v2, %v293_v1  ;;  %v296_v5 = vld [vmem:[#allocation7 + $0x58] sm:$0xff]  ;;  %v297_v7 = vld [vmem:[#allocation7 + $0x60] sm:$0xff] }
  0x6b   : > { %274 = vst.msk [vmem:[#allocation2 + $0x11] sm:$0x1] %vm272_vm0, %v1517_v0  ;;  %568 = vst.msk [vmem:[#allocation3] sm:$0x1] %vm272_vm0, %v1517_v0  ;;  %v1182_v6 = vpack.c.bf16 %v296_v5, %v295_v3  ;;  %v298_v8 = vld [vmem:[#allocation7 + $0x68] sm:$0xff]  ;;  %v1746_v9 = vld [vmem:[%s237_s12] sm:$0xff] }
  0x6c   : > { %569 = vst.msk [vmem:[#allocation3 + $0x11] sm:$0x1] %vm272_vm0, %v1517_v0  ;;  %1179 = vmatprep.subr.bf16.mxu0 %v1178_v4  ;;  %v1750_v10 = vld [vmem:[%s237_s12 + $0x8] sm:$0xff]  ;;  %v1186_v11 = vpack.c.bf16 %v298_v8, %v297_v7  ;;  %v299_v12 = vld [vmem:[#allocation7 + $0x70] sm:$0xff]  ;;  %v585_v14 = vld [vmem:[#allocation9 + $0x40] sm:$0xff]  ;;  %s1003_s10 = sshll.u32 %s1572_s22, 8 }
  0x6d   : > { %278 = vst.msk [vmem:[#allocation2 + $0x1] sm:$0xff] %vm277_vm1, %v1746_v9  ;;  %1181 = vmatpush3.bf16.msra.mxu0 %v1178_v4  ;;  %279 = vst.msk [vmem:[#allocation2 + $0x9] sm:$0xff] %vm277_vm1, %v1750_v10  ;;  %v300_v13 = vld [vmem:[#allocation7 + $0x78] sm:$0xff]  ;;  %v586_v16 = vld [vmem:[#allocation9 + $0x48] sm:$0xff]  ;;  %s271_s28 = scalar_lea.vmem [#allocation10], %s979_s6  ;;  %s1781_s11 = scalar_lea.hbm %s1835_s5, %s1003_s10 }
  0x6e   : > { %1183 = vmatprep.subr.bf16.mxu0 %v1182_v6  ;;  %v1190_v15 = vpack.c.bf16 %v300_v13, %v299_v12  ;;  %v282_v18 = vld [vmem:[#allocation7] sm:$0xff]  ;;  %v283_v19 = vld [vmem:[#allocation7 + $0x8] sm:$0xff]  ;;  %v1226_v20 = vpack.c.bf16 %v586_v16, %v585_v14  ;;  %v284_v22 = vld [vmem:[#allocation7 + $0x10] sm:$0xff]  ;;  %s878_s13 = sshll.u32 %s271_s28, 4  ;;  %s865_s22 = scalar_lea.sflag [#allocation6], %s1732_s14  ;;  %s1783_s13 = int_to_ptr.vmem [resolvable:$true] %s878_s13 }
  0x6f   : > { %v1194_v21 = vpack.c.bf16 %v283_v19, %v282_v18  ;;  %v285_v23 = vld [vmem:[#allocation7 + $0x18] sm:$0xff]  ;;  %v286_v27 = vld [vmem:[#allocation7 + $0x20] sm:$0xff]  ;;  %v287_v28 = vld [vmem:[#allocation7 + $0x28] sm:$0xff]  ;;  %s1440_s17 = scalar_lea.vmem %s1783_s13, 256  ;;  %p1849_p0 = scmp.ne.s32.totalorder %s1844_s23, 0 }
  0x70   : > { %1227 = vmatprep.subr.bf16.mxu1 %v1226_v20  ;;  %v1198_v25 = vpack.c.bf16 %v285_v23, %v284_v22  ;;  %v1202_v29 = vpack.c.bf16 %v287_v28, %v286_v27  ;;  %v288_v30 = vld [vmem:[#allocation7 + $0x30] sm:$0xff]  ;;  %v289_v31 = vld [vmem:[#allocation7 + $0x38] sm:$0xff]  ;;  %v466_v33 = vld [vmem:[#allocation7 + $0x80] sm:$0xff]  ;;  %p1441_p11 = scmp.ne.s32.totalorder %s1783_s13, %s1440_s17  ;;  %s1518_s7 = smov [#allocation10]  }
  0x71   : > { %1185 = vmatpush3.bf16.msra.mxu0 %v1182_v6  ;;  %1229 = vmatpush3.bf16.msra.mxu1 %v1226_v20  ;;  %v1206_v32 = vpack.c.bf16 %v289_v31, %v288_v30  ;;  %v467_v34 = vld [vmem:[#allocation7 + $0x88] sm:$0xff]  ;;  %v468_v36 = vld [vmem:[#allocation7 + $0x90] sm:$0xff]  ;;  %v469_v37 = vld [vmem:[#allocation7 + $0x98] sm:$0xff]  ;;  %s1444_s6 = sshll.u32 %s1518_s7, 4  ;;  %s1445_s6 = int_to_ptr.vmem [resolvable:$false] %s1444_s6 }
  0x72   : > { %1187 = vmatprep.subr.bf16.mxu0 %v1186_v11  ;;  %v1210_v35 = vpack.c.bf16 %v467_v34, %v466_v33  ;;  %v1214_v39 = vpack.c.bf16 %v469_v37, %v468_v36  ;;  %v470_v41 = vld [vmem:[#allocation7 + $0xa0] sm:$0xff]  ;;  %v471_v42 = vld [vmem:[#allocation7 + $0xa8] sm:$0xff]  ;;  %v472_v44 = vld [vmem:[#allocation7 + $0xb0] sm:$0xff]  ;;  %p1442_p2 = pnand %p1441_p11, %p1849_p0  ;;  %s1446_s8 = scalar_lea.vmem %s1445_s6, 512 }
  0x73   : > { %v1218_v43 = vpack.c.bf16 %v471_v42, %v470_v41  ;;  %v473_v45 = vld [vmem:[#allocation7 + $0xb8] sm:$0xff]  ;;  %v587_v48 = vld [vmem:[#allocation9 + $0x50] sm:$0xff]  ;;  %v589_v51 = vld [vmem:[#allocation9 + $0x60] sm:$0xff]  ;;  %p1447_p7 = scmp.lt.s32.totalorder %s1783_s13, %s1445_s6  ;;  %p1448_p9 = scmp.lt.s32.totalorder %s1446_s8, %s1440_s17 }
  0x74   : > { %v290_v17 = vld [vmem:[#allocation2 + $0x1] sm:$0xff]  ;;  %v291_v24 = vld [vmem:[#allocation2 + $0x9] sm:$0xff]  ;;  %v1222_v46 = vpack.c.bf16 %v473_v45, %v472_v44  ;;  %v590_v52 = vld [vmem:[#allocation9 + $0x68] sm:$0xff]  ;;  %p1443_p3 = pneg %p1442_p2 }
  0x75   : > { %1080 = vmatprep.mubr.msk.f32.mxu0 %vm277_vm1, %v290_v17  ;;  %1189 = vmatpush3.bf16.msra.mxu0 %v1186_v11  ;;  %v280_v26 = vld [vmem:[#allocation2] sm:$0xff]  ;;  %v281_v38 = vld [vmem:[#allocation2 + $0x8] sm:$0xff]  ;;  %v1234_v53 = vpack.c.bf16 %v590_v52, %v589_v51  ;;  %v574_v57 = vld [vmem:[#allocation9] sm:$0xff]  ;;  %p1449_p12 = por %p1448_p9, %p1447_p7 }
  0x76   : > { %1191 = vmatprep.subr.bf16.mxu0 %v1190_v15  ;;  %v463_v40 = vld [vmem:[#allocation2 + $0x2] sm:$0xff]  ;;  %v464_v47 = vld [vmem:[#allocation2 + $0xa] sm:$0xff]  ;;  %v575_v58 = vld [vmem:[#allocation9 + $0x8] sm:$0xff] }
  0x77   : > { %v588_v49 = vld [vmem:[#allocation9 + $0x58] sm:$0xff]  ;;  %v591_v54 = vld [vmem:[#allocation9 + $0x70] sm:$0xff]  ;;  %v1242_v59 = vpack.c.bf16 %v575_v58, %v574_v57  ;;  %v578_v8 = vld [vmem:[#allocation9 + $0x20] sm:$0xff]  ;;  %p1450_p1 = pnand %p1449_p12, %p1443_p3 }
  0x78   : > { %v1230_v50 = vpack.c.bf16 %v588_v49, %v587_v48  ;;  %v592_v55 = vld [vmem:[#allocation9 + $0x78] sm:$0xff]  ;;  %v989_v60 = vld [vmem:[%s1833_s3] ss:$0 sm:$0xff]  ;;  %v579_v11 = vld [vmem:[#allocation9 + $0x28] sm:$0xff] }
  0x79   : > { %1193 = vmatpush3.bf16.msra.mxu0 %v1190_v15  ;;  %v1238_v56 = vpack.c.bf16 %v592_v55, %v591_v54  ;;  %v576_v3 = vld [vmem:[#allocation9 + $0x10] sm:$0xff]  ;;  %v577_v4 = vld [vmem:[#allocation9 + $0x18] sm:$0xff]  ;;  %v1250_v13 = vpack.c.bf16 %v579_v11, %v578_v8  ;;  %v758_v17 = vld [vmem:[#allocation9 + $0x80] sm:$0xff] }
  0x7a   : > { %1195 = vmatprep.subr.bf16.mxu0 %v1194_v21  ;;  %1231 = vmatprep.subr.bf16.mxu1 %v1230_v50  ;;  %v1246_v6 = vpack.c.bf16 %v577_v4, %v576_v3  ;;  %v580_v14 = vld [vmem:[#allocation9 + $0x30] sm:$0xff]  ;;  %v581_v15 = vld [vmem:[#allocation9 + $0x38] sm:$0xff]  ;;  %v759_v18 = vld [vmem:[#allocation9 + $0x88] sm:$0xff] }
  0x7b   : > { %1233 = vmatpush3.bf16.msra.mxu1 %v1230_v50  ;;  %v1254_v16 = vpack.c.bf16 %v581_v15, %v580_v14  ;;  %v1258_v19 = vpack.c.bf16 %v759_v18, %v758_v17  ;;  %v760_v20 = vld [vmem:[#allocation9 + $0x90] sm:$0xff] }
  0x7c   : > { %1081 = vmatmul.mubr.msk.f32.vlgmr.msra.gmra.mrb[0].mxu0 %vm277_vm1, %v291_v24  ;;  %1235 = vmatprep.subr.bf16.mxu1 %v1234_v53  ;;  %v762_v24 = vld [vmem:[#allocation9 + $0xa0] sm:$0xff]  ;;  %v764_v28 = vld [vmem:[#allocation9 + $0xb0] sm:$0xff] }
  0x7d   : > { %1197 = vmatpush3.bf16.msra.mxu0 %v1194_v21  ;;  %1099 = vmatprep.mubr.msk.f32.mxu0 %vm277_vm1, %v280_v26  ;;  %v761_v21 = vld [vmem:[#allocation9 + $0x98] sm:$0xff] }
  0x7e   : > { %1199 = vmatprep.subr.bf16.mxu0 %v1198_v25  ;;  %v1262_v22 = vpack.c.bf16 %v761_v21, %v760_v20 }
  0x7f   : > { %1237 = vmatpush3.bf16.msra.mxu1 %v1234_v53 }
  0x80   : > { %1239 = vmatprep.subr.bf16.mxu1 %v1238_v56 }
  0x81   : > { %1201 = vmatpush3.bf16.msra.mxu0 %v1198_v25  ;;  %v763_v25 = vld [vmem:[#allocation9 + $0xa8] sm:$0xff] }
  0x82   : > { %1203 = vmatprep.subr.bf16.mxu0 %v1202_v29  ;;  %v1266_v27 = vpack.c.bf16 %v763_v25, %v762_v24 }
  0x83   : > { %1241 = vmatpush3.bf16.msra.mxu1 %v1238_v56 }
  0x84   : > { %1243 = vmatprep.subr.bf16.mxu1 %v1242_v59 }
  0x85   : > { %1205 = vmatpush3.bf16.msra.mxu0 %v1202_v29  ;;  %v765_v29 = vld [vmem:[#allocation9 + $0xb8] sm:$0xff] }
  0x86   : > { %1207 = vmatprep.subr.bf16.mxu0 %v1206_v32  ;;  %v1270_v30 = vpack.c.bf16 %v765_v29, %v764_v28 }
  0x89   : > { %1209 = vmatpush3.bf16.msra.mxu0 %v1206_v32  ;;  %v996_v32 = vld [vmem:[%s1834_s4] ss:$0 sm:$0xff] }
  0x8a   : > { %1211 = vmatprep.subr.bf16.mxu0 %v1210_v35 }
  0x8c   : > { %1100 = vmatmul.mubr.msk.f32.vlgmr.msra.gmra.mrb[0].mxu0 %vm277_vm1, %v281_v38 }
  0x8d   : > { %1213 = vmatpush3.bf16.msra.mxu0 %v1210_v35  ;;  %1118 = vmatprep.mubr.msk.f32.mxu0 %vm277_vm1, %v463_v40 }
  0x8e   : > { %1215 = vmatprep.subr.bf16.mxu0 %v1214_v39 }
  0x91   : > { %1217 = vmatpush3.bf16.msra.mxu0 %v1214_v39 }
  0x92   : > { %1219 = vmatprep.subr.bf16.mxu0 %v1218_v43 }
  0x95   : > { %1221 = vmatpush3.bf16.msra.mxu0 %v1218_v43 }
  0x96   : > { %1223 = vmatprep.subr.bf16.mxu0 %v1222_v46 }
  0x99   : > { %1225 = vmatpush3.bf16.msra.mxu0 %v1222_v46 }
  0x9c   : > { %1119 = vmatmul.mubr.msk.f32.vlgmr.msra.gmra.mrb[0].mxu0 %vm277_vm1, %v464_v47 }
 0x16f   : > { %v1120_v61 = vpop.f32.mrb[0].mxu0 }
 0x170   : > { %v565_v62 = vadd.f32 %v1120_v61, %v989_v60  ;;  %v546_v63 = vpop.f32.mrb[1].mxu0 }
 0x171   : > { %v564_v0 = vadd.f32 %v989_v60, %v546_v63 }
 0x172   : > { %v567_v1 = vmax.f32 %v565_v62, 0.0 }
 0x173   : > { %v566_v2 = vmax.f32 %v564_v0, 0.0 }
 0x174   : > { %571 = vst.msk [vmem:[#allocation3 + $0x9] sm:$0xff] %vm277_vm1, %v567_v1 }
 0x175   : > { %570 = vst.msk [vmem:[#allocation3 + $0x1] sm:$0xff] %vm277_vm1, %v566_v2 }
 0x17b   : > { %v583_v7 = vld [vmem:[#allocation3 + $0x9] sm:$0xff] }
 0x17c   : > { %v582_v5 = vld [vmem:[#allocation3 + $0x1] sm:$0xff]  ;;  %v756_v31 = vld [vmem:[#allocation3 + $0xa] sm:$0xff] }
 0x17d   : > { %1137 = vmatprep.mubr.msk.f32.mxu1 %vm277_vm1, %v582_v5  ;;  %v572_v12 = vld [vmem:[#allocation3] sm:$0xff]  ;;  %v573_v23 = vld [vmem:[#allocation3 + $0x8] sm:$0xff] }
 0x17e   : > { %1138 = vmatmul.mubr.msk.f32.vlgmr.msra.gmra.mrb[0].mxu1 %vm277_vm1, %v583_v7  ;;  %v755_v26 = vld [vmem:[#allocation3 + $0x2] sm:$0xff] }
 0x17f   : > { %1245 = vmatpush3.bf16.msra.mxu1 %v1242_v59  ;;  %1156 = vmatprep.mubr.msk.f32.mxu1 %vm277_vm1, %v572_v12 }
 0x180   : > { %1247 = vmatprep.subr.bf16.mxu1 %v1246_v6 }
 0x183   : > { %1249 = vmatpush3.bf16.msra.mxu1 %v1246_v6 }
 0x184   : > { %1251 = vmatprep.subr.bf16.mxu1 %v1250_v13 }
 0x187   : > { %1253 = vmatpush3.bf16.msra.mxu1 %v1250_v13 }
 0x188   : > { %1255 = vmatprep.subr.bf16.mxu1 %v1254_v16 }
 0x18b   : > { %1257 = vmatpush3.bf16.msra.mxu1 %v1254_v16 }
 0x18c   : > { %1259 = vmatprep.subr.bf16.mxu1 %v1258_v19 }
 0x18e   : > { %1157 = vmatmul.mubr.msk.f32.vlgmr.msra.gmra.mrb[0].mxu1 %vm277_vm1, %v573_v23 }
 0x18f   : > { %1261 = vmatpush3.bf16.msra.mxu1 %v1258_v19  ;;  %1175 = vmatprep.mubr.msk.f32.mxu1 %vm277_vm1, %v755_v26 }
 0x190   : > { %1263 = vmatprep.subr.bf16.mxu1 %v1262_v22 }
 0x193   : > { %1265 = vmatpush3.bf16.msra.mxu1 %v1262_v22 }
 0x194   : > { %1267 = vmatprep.subr.bf16.mxu1 %v1266_v27 }
 0x197   : > { %1269 = vmatpush3.bf16.msra.mxu1 %v1266_v27 }
 0x198   : > { %1271 = vmatprep.subr.bf16.mxu1 %v1270_v30 }
 0x19b   : > { %1273 = vmatpush3.bf16.msra.mxu1 %v1270_v30 }
 0x19e   : > { %1176 = vmatmul.mubr.msk.f32.vlgmr.msra.gmra.mrb[0].mxu1 %vm277_vm1, %v756_v31 }
 0x271   : > { %v1177_v33 = vpop.f32.mrb[0].mxu1 }
 0x272   : > { %v857_v34 = vadd.f32 %v1177_v33, %v996_v32  ;;  %v838_v35 = vpop.f32.mrb[1].mxu1 }
 0x273   : > { %v856_v36 = vadd.f32 %v996_v32, %v838_v35 }
 0x274   : > { %v861_v37 = vadd.f32 %v857_v34, %v1750_v10 }
 0x275   : > { %v860_v38 = vadd.f32 %v856_v36, %v1746_v9 }
 0x276   : > { %863 = vst.msk [vmem:[%s271_s28 + $0x8] sm:$0xff] %vm277_vm1, %v861_v37 }
 0x277   : > { %862 = vst.msk [vmem:[%s271_s28] sm:$0xff] %vm277_vm1, %v860_v38 }
 0x278   : > { %1453 = shalt.err (!%p1450_p1)
}
 0x279   : > { %s1454_s12 = scalar_lea.hbm %s1781_s11, 256  ;;  %s1458_s15 = scalar_lea.hbm %s1835_s5, 512 }
 0x27a   : > { %p1455_p13 = scmp.ne.s32.totalorder %s1781_s11, %s1454_s12  ;;  %p1459_p4 = scmp.lt.u32.totalorder %s1781_s11, %s1835_s5 }
 0x27b   : > { %p1460_p5 = scmp.lt.u32.totalorder %s1458_s15, %s1454_s12  ;;  %p1462_p11 = scmp.lt.u32.totalorder %s1454_s12, %s1781_s11 }
 0x27c   : > { %p1456_p6 = pnand %p1455_p13, %p1849_p0 }
 0x27d   : > { %p1461_p8 = por %p1460_p5, %p1459_p4 }
 0x27e   : > { %p1457_p10 = pneg %p1456_p6 }
 0x27f   : > { %p1463_p2 = por %p1462_p11, %p1461_p8 }
 0x281   : > { %p1464_p3 = pnand %p1463_p2, %p1457_p10 }
 0x283   : > { %1467 = shalt.err (!%p1464_p3)
}
 0x284   : > { %s1519_s28 = smov 128   ;;  %s1520_s9 = smov 8  }
 0x285   : > { %1292 = dma.vmem_to_hbm [thread:$0]  (%p1849_p0), %s1783_s13, 256, %s1781_s11, %s865_s22, %s1519_s28, %s1519_s28, %s1520_s9  }
 0x286 PF: > { %s893_s30 = sand.u32 1, %s1498_s18   ;;  %p1850_p7 = scmp.ne.s32.totalorder %s1840_s25, 0 }
 0x287   : > { %p1851_p9 = scmp.ge.s32.totalorder %s1510_s21, 2  ;;  %s894_s17 = scalar_lea.sflag [#allocation6], %s893_s30 }
 0x289   : > { %p1306_p12 = pnand %p1851_p9, %p1850_p7 }
 0x28b   : > { %1493 = dma.done.wait (!%p1306_p12), %s894_s17, 256  }
 0x28c   : > { %1495 = vsyncadd (!%p1306_p12), %s894_s17, 4294967040  ;;  %p19_p1 = scmp.ge.s32.totalorder %s1667_s29, 4   ;;  %s1852_s18 = smov %s1502_s19 }
 0x28d   : > { %s1853_s19 = smov %s1506_s20  ;;  %s1854_s20 = smov %s1683_s27 }
 0x28e   : > { %s1855_s21 = smov %s1667_s29  ;;  %21 = sbr.rel (!%p19_p1) target bundleno = 6 (0x6), region = 97 }
 0x295   :  { %899 = vsyncpa [#allocation5], 1 }
 0x296   :  { %901 = vsyncpa [#allocation5 + $0x1], 1 }
 0x297   :  { %902 = vsyncpa [#allocation8], 1 }
 0x298   :  { %903 = vsyncpa [#allocation6], 1 }
 0x299   :  { %905 = vsyncpa [#allocation6 + $0x1], 1 }

</bundles_post_ra>
